<compile_context>
chip_gen: v6e
topology: v6e:2x2x1
jax: 0.10.0
libtpu: 0.0.40
codegen_flags: <defaults>
</compile_context>

<pallas_src>
import functools

import jax
import jax.numpy as jnp
from jax.experimental import pallas as pl
from jax.experimental.pallas import tpu as pltpu


def _attention_kernel(x_ref, w_ref, b_ref, o_ref, acc_ref, *,
                      inv_hw, hw, tile_hw, needs_mask):
    # x_ref: (tb, C, tile_hw)   w_ref: (C, K)   b_ref: (1, K)
    # o_ref: (tb, K)            acc_ref: (tb, C) f32 scratch
    j = pl.program_id(1)

    @pl.when(j == 0)
    def _init():
        acc_ref[...] = jnp.zeros_like(acc_ref)

    x = x_ref[...]
    if needs_mask:
        # Mask lanes beyond the true HW extent (ragged last tile).
        col = j * tile_hw + jax.lax.broadcasted_iota(jnp.int32, x.shape, x.ndim - 1)
        x = jnp.where(col < hw, x, jnp.zeros_like(x))

    # Raw sums per (batch, channel); widen-to-f32 fused into the reduction.
    acc_ref[...] += jnp.sum(x, axis=-1, dtype=jnp.float32)

    @pl.when(j == pl.num_programs(1) - 1)
    def _finalize():
        pooled = acc_ref[...] * jnp.float32(inv_hw)               # (tb, C)
        logits = jnp.dot(pooled, w_ref[...].astype(jnp.float32),
                         preferred_element_type=jnp.float32)      # (tb, K)
        logits = logits + b_ref[...].astype(jnp.float32)
        o_ref[...] = jax.nn.sigmoid(logits).astype(o_ref.dtype)


def attention_forward(x_nchw, conv_weight, conv_bias, *,
                      batch_block=8, x_tile_bytes=8 * 1024 * 1024):
    """x_nchw: (B, C, H, W); conv_weight: (K, C, 1, 1); conv_bias: (K,)."""
    B, C, H, W = x_nchw.shape
    K = conv_weight.shape[0]
    HW = H * W

    x_flat = x_nchw.reshape(B, C, HW)                 # (B, C, HW)
    w = conv_weight.reshape(K, C).T.astype(jnp.float32)  # (C, K)
    b = conv_bias.reshape(1, K).astype(jnp.float32)       # (1, K)

    # --- tile sizing -------------------------------------------------------
    tb = min(B, batch_block)                          # batch rows per block
    itemsize = jnp.dtype(x_nchw.dtype).itemsize
    # VMEM cost per HW column of an x block (C padded to >=8 sublanes).
    bytes_per_col = tb * max(C, 8) * itemsize
    max_cols = max(128, (x_tile_bytes // bytes_per_col) // 128 * 128)
    if HW <= max_cols:
        tile_hw = HW                                  # single tile (full axis)
    else:
        tile_hw = max_cols                            # multiple of 128 lanes
    grid = (pl.cdiv(B, tb), pl.cdiv(HW, tile_hw))
    needs_mask = (HW % tile_hw) != 0

    kernel = functools.partial(_attention_kernel, inv_hw=1.0 / HW, hw=HW,
                               tile_hw=tile_hw, needs_mask=needs_mask)

    cost = pl.CostEstimate(
        flops=B * C * HW + 2 * B * C * K,
        transcendentals=B * K,
        bytes_accessed=B * C * HW * itemsize + (C * K + K) * 4 + B * K * itemsize,
    )

    return pl.pallas_call(
        kernel,
        out_shape=jax.ShapeDtypeStruct((B, K), x_nchw.dtype),
        grid_spec=pltpu.PrefetchScalarGridSpec(
            num_scalar_prefetch=0,
            grid=grid,
            in_specs=[
                # x: tile over (batch block, HW tile), full channel axis.
                pl.BlockSpec((tb, C, tile_hw), lambda i, j: (i, 0, j)),
                # weight / bias: loop-invariant, resident in VMEM.
                pl.BlockSpec((C, K), lambda i, j: (0, 0)),
                pl.BlockSpec((1, K), lambda i, j: (0, 0)),
            ],
            out_specs=pl.BlockSpec((tb, K), lambda i, j: (i, 0)),
            scratch_shapes=[pltpu.VMEM((tb, C), jnp.float32)],
        ),
        compiler_params=pltpu.CompilerParams(
            dimension_semantics=("parallel", "arbitrary"),
            vmem_limit_bytes=48 * 1024 * 1024,
        ),
        cost_estimate=cost,
    )(x_flat, w, b)


def attention_reference(x_nchw, conv_weight, conv_bias):
    B, C, H, W = x_nchw.shape
    K = conv_weight.shape[0]
    pooled = jnp.mean(x_nchw.astype(jnp.float32), axis=(2, 3))            # (B, C)
    logits = pooled @ conv_weight.reshape(K, C).T.astype(jnp.float32)
    logits = logits + conv_bias.astype(jnp.float32)
    return jax.nn.sigmoid(logits)


if __name__ == "__main__":
    key = jax.random.PRNGKey(0)

    # --- Test 1: shapes consistent with the module (B=2, in_planes=4, 16x16, K=8).
    B, C, H, W, K = 2, 4, 16, 16, 8
    kx, kw, kb = jax.random.split(key, 3)
    x = jax.random.normal(kx, (B, C, H, W), dtype=jnp.float32)
    conv_weight = jax.random.normal(kw, (K, C, 1, 1), dtype=jnp.float32) * 0.1
    conv_bias = jax.random.normal(kb, (K,), dtype=jnp.float32) * 0.1

    out = jax.block_until_ready(attention_forward(x, conv_weight, conv_bias))
    ref = attention_reference(x, conv_weight, conv_bias)
    assert out.shape == (B, K), out.shape
    assert jnp.allclose(out, ref, atol=1e-5, rtol=1e-5), (out, ref)

    # --- Test 2: exercises the tiled/masked reduction and a partial batch block
    # (small x_tile_bytes forces tile_hw=128 with a ragged last HW tile).
    B2, C2, H2, W2, K2 = 10, 5, 20, 20, 8
    kx2, kw2, kb2 = jax.random.split(jax.random.PRNGKey(1), 3)
    x2 = jax.random.normal(kx2, (B2, C2, H2, W2), dtype=jnp.float32)
    w2 = jax.random.normal(kw2, (K2, C2, 1, 1), dtype=jnp.float32) * 0.1
    b2 = jax.random.normal(kb2, (K2,), dtype=jnp.float32) * 0.1

    out2 = jax.block_until_ready(
        attention_forward(x2, w2, b2, x_tile_bytes=16 * 1024))
    ref2 = attention_reference(x2, w2, b2)
    assert out2.shape == (B2, K2), out2.shape
    assert jnp.allclose(out2, ref2, atol=1e-5, rtol=1e-5), (out2, ref2)

    print("KERNEL_OK")
</pallas_src>

<mosaic_0001>
module attributes {stable_mosaic.version = 11 : i64} {
  func.func @_attention_kernel(%arg0: i32, %arg1: i32, %arg2: memref<2x4x256xf32, #tpu.memory_space<vmem>>, %arg3: memref<4x8xf32, #tpu.memory_space<vmem>>, %arg4: memref<1x8xf32, #tpu.memory_space<vmem>>, %arg5: memref<2x8xf32, #tpu.memory_space<vmem>>, %arg6: memref<2x4xf32, #tpu.memory_space<vmem>>) attributes {dimension_semantics = [#tpu.dimension_semantics<parallel>, #tpu.dimension_semantics<arbitrary>], iteration_bounds = array<i64: 1, 1>, scalar_prefetch = 0 : i64, scratch_operands = 1 : i64, tpu.core_type = #tpu.core_type<tc>, window_params = [{transform_indices = @transform_0, window_bounds = array<i64: 2, 4, 256>}, {pipeline_mode = #tpu.pipeline_mode<synchronous>, transform_indices = @transform_1, window_bounds = array<i64: 4, 8>}, {pipeline_mode = #tpu.pipeline_mode<synchronous>, transform_indices = @transform_2, window_bounds = array<i64: 1, 8>}, {transform_indices = @transform_3, window_bounds = array<i64: 2, 8>}]} {
    %c0_i32 = arith.constant 0 : i32
    %0 = arith.cmpi eq, %arg1, %c0_i32 : i32
    %1 = arith.extui %0 : i1 to i32
    %c0_i32_0 = arith.constant 0 : i32
    %2 = arith.cmpi ne, %1, %c0_i32_0 : i32
    scf.if %2 {
      %cst_9 = arith.constant 0.000000e+00 : f32
      %11 = vector.broadcast %cst_9 : f32 to vector<2x4xf32>
      %c0_10 = arith.constant 0 : index
      %c0_11 = arith.constant 0 : index
      %12 = vector.load %arg6[%c0_10, %c0_11] : memref<2x4xf32, #tpu.memory_space<vmem>>, vector<2x4xf32>
      tpu.vector_store %arg6[%c0_10, %c0_11], %11 {strides = array<i32>} : memref<2x4xf32, #tpu.memory_space<vmem>>, vector<2x4xf32>,
    } else {
    }
    %c0 = arith.constant 0 : index
    %c0_1 = arith.constant 0 : index
    %c0_2 = arith.constant 0 : index
    %3 = vector.load %arg2[%c0, %c0_1, %c0_2] : memref<2x4x256xf32, #tpu.memory_space<vmem>>, vector<2x4x256xf32>
    %c0_3 = arith.constant 0 : index
    %c0_4 = arith.constant 0 : index
    %4 = vector.load %arg6[%c0_3, %c0_4] : memref<2x4xf32, #tpu.memory_space<vmem>>, vector<2x4xf32>
    %cst = arith.constant dense<0.000000e+00> : vector<2x4xf32>
    %5 = vector.multi_reduction <add>, %3, %cst [2] : vector<2x4x256xf32> to vector<2x4xf32>
    %6 = arith.addf %4, %5 : vector<2x4xf32>
    %c0_5 = arith.constant 0 : index
    %c0_6 = arith.constant 0 : index
    %7 = vector.load %arg6[%c0_5, %c0_6] : memref<2x4xf32, #tpu.memory_space<vmem>>, vector<2x4xf32>
    tpu.vector_store %arg6[%c0_5, %c0_6], %6 {strides = array<i32>} : memref<2x4xf32, #tpu.memory_space<vmem>>, vector<2x4xf32>,
    %c0_i32_7 = arith.constant 0 : i32
    %8 = arith.cmpi eq, %arg1, %c0_i32_7 : i32
    %9 = arith.extui %8 : i1 to i32
    %c0_i32_8 = arith.constant 0 : i32
    %10 = arith.cmpi ne, %9, %c0_i32_8 : i32
    scf.if %10 {
      %c0_9 = arith.constant 0 : index
      %c0_10 = arith.constant 0 : index
      %11 = vector.load %arg6[%c0_9, %c0_10] : memref<2x4xf32, #tpu.memory_space<vmem>>, vector<2x4xf32>
      %cst_11 = arith.constant 3.906250e-03 : f32
      %12 = vector.broadcast %cst_11 : f32 to vector<2x4xf32>
      %13 = arith.mulf %11, %12 : vector<2x4xf32>
      %c0_12 = arith.constant 0 : index
      %c0_13 = arith.constant 0 : index
      %14 = vector.load %arg3[%c0_12, %c0_13] : memref<4x8xf32, #tpu.memory_space<vmem>>, vector<4x8xf32>
      %cst_14 = arith.constant dense<0.000000e+00> : vector<2x8xf32>
      %15 = tpu.matmul %13, %14, %cst_14 {dimension_numbers = #tpu.dot_dimension_numbers<[1], [0], [0], [1], [0, 0, 1, 1], [], []>} : vector<2x4xf32>, vector<4x8xf32>, vector<2x8xf32> -> vector<2x8xf32>
      %c0_15 = arith.constant 0 : index
      %c0_16 = arith.constant 0 : index
      %16 = vector.load %arg4[%c0_15, %c0_16] : memref<1x8xf32, #tpu.memory_space<vmem>>, vector<1x8xf32>
      %17 = vector.broadcast %16 : vector<1x8xf32> to vector<2x8xf32>
      %18 = arith.addf %15, %17 : vector<2x8xf32>
      %19 = arith.negf %18 : vector<2x8xf32>
      %20 = math.exp %19 : vector<2x8xf32>
      %cst_17 = arith.constant 1.000000e+00 : f32
      %21 = vector.broadcast %cst_17 : f32 to vector<2x8xf32>
      %22 = arith.addf %21, %20 : vector<2x8xf32>
      %23 = arith.divf %21, %22 : vector<2x8xf32>
      %c0_18 = arith.constant 0 : index
      %c0_19 = arith.constant 0 : index
      %24 = vector.load %arg5[%c0_18, %c0_19] : memref<2x8xf32, #tpu.memory_space<vmem>>, vector<2x8xf32>
      tpu.vector_store %arg5[%c0_18, %c0_19], %23 {strides = array<i32>} : memref<2x8xf32, #tpu.memory_space<vmem>>, vector<2x8xf32>,
    } else {
    }
    return
  }
  func.func @transform_0(%arg0: i32, %arg1: i32) -> (i32, i32, i32) {
    %c0_i32 = arith.constant 0 : i32
    %c0_i32_0 = arith.constant 0 : i32
    return %arg0, %c0_i32, %arg1 : i32, i32, i32
  }
  func.func @transform_1(%arg0: i32, %arg1: i32) -> (i32, i32) {
    %c0_i32 = arith.constant 0 : i32
    %c0_i32_0 = arith.constant 0 : i32
    %c0_i32_1 = arith.constant 0 : i32
    return %c0_i32, %c0_i32_0 : i32, i32
  }
  func.func @transform_2(%arg0: i32, %arg1: i32) -> (i32, i32) {
    %c0_i32 = arith.constant 0 : i32
    %c0_i32_0 = arith.constant 0 : i32
    %c0_i32_1 = arith.constant 0 : i32
    return %c0_i32, %c0_i32_0 : i32, i32
  }
  func.func @transform_3(%arg0: i32, %arg1: i32) -> (i32, i32) {
    %c0_i32 = arith.constant 0 : i32
    %c0_i32_0 = arith.constant 0 : i32
    return %arg0, %c0_i32 : i32, i32
  }
}

</mosaic_0001>

<bundles_post_ra>
// kernel: tpu_custom_call.1
= control target key start
LH: loop header
LB: loop body
LE: loop exit
PB: predicated region body
PF: predicated region fallthrough
CT: control target
= control target key end

     0   :  { %8 = vsyncpa [#allocation4], 0  ;;  %s335_s0 = inlined_call_operand.hbm [shape: f32[2,4,256], index: 0, kind: input, shape index: {}]   ;;  %s336_s1 = inlined_call_operand.hbm [shape: f32[4,8], index: 1, kind: input, shape index: {}]   ;;  %s337_s2 = inlined_call_operand.vmem [shape: f32[1,8], index: 2, kind: input, shape index: {}]   ;;  %s338_s3 = inlined_call_operand.hbm [shape: f32[2,8], index: 3, kind: output, shape index: {}]  }
   0x1   :  { %9 = vsyncpa [#allocation7], 0 }
   0x2   :  { %10 = vsyncpa [#allocation5], 0  ;;  %s289_s12 = smov [#allocation3]  }
   0x3   :  { %s16_s13 = sshll.u32 %s289_s12, 4  ;;  %s17_s13 = int_to_ptr.vmem [resolvable:$true] %s16_s13 }
   0x4   :  { %s231_s14 = scalar_lea.vmem %s17_s13, 256  ;;  %p236_p1 = scmp.lt.s32.totalorder %s17_s13, %s17_s13 }
   0x5   :  { %p232_p0 = scmp.ne.s32.totalorder %s17_s13, %s231_s14  ;;  %p237_p2 = scmp.lt.s32.totalorder %s231_s14, %s231_s14 }
   0x7   :  { %p238_p3 = por %p237_p2, %p236_p1 }
   0x9   :  { %p239_p4 = pnand %p238_p3, %p232_p0 }
   0xb   :  { %242 = shalt.err (!%p239_p4)
}
   0xc   :  { %s290_s15 = smov 128   ;;  %s291_s16 = smov 8  }
   0xd   :  { %22 = dma.hbm_to_vmem [thread:$0]  %s335_s0, 256, %s17_s13, [#allocation4], %s290_s15, %s290_s15, %s291_s16  }
   0xe   :  { %s292_s19 = smov [#allocation6]  }
   0xf   :  { %s29_s20 = sshll.u32 %s292_s19, 4  ;;  %s30_s20 = int_to_ptr.vmem [resolvable:$true] %s29_s20 }
  0x10   :  { %s251_s21 = scalar_lea.vmem %s30_s20, 64  ;;  %p256_p6 = scmp.lt.s32.totalorder %s30_s20, %s30_s20 }
  0x11   :  { %p252_p5 = scmp.ne.s32.totalorder %s30_s20, %s251_s21  ;;  %p257_p7 = scmp.lt.s32.totalorder %s251_s21, %s251_s21 }
  0x13   :  { %p258_p8 = por %p257_p7, %p256_p6 }
  0x15   :  { %p259_p9 = pnand %p258_p8, %p252_p5 }
  0x17   :  { %262 = shalt.err (!%p259_p9)
}
  0x18   :  { %32 = dma.hbm_to_vmem [thread:$0]  %s336_s1, 64, %s30_s20, [#allocation7]  }
  0x19   :  { %283 = dma.done.wait [#allocation4], 256  }
  0x1a   :  { %284 = vsyncadd [#allocation4], 4294967040 }
  0x1b   :  { %285 = dma.done.wait [#allocation7], 64  }
  0x1c   :  { %286 = vsyncadd [#allocation7], 4294967232  ;;  %vm56_vm0 = vcmask 1043456   ;;  %v47_v0 = vld [vmem:[#allocation3] sm:$0xff]  ;;  %v48_v1 = vld [vmem:[#allocation3 + $0x8] sm:$0xff]  ;;  %vm45_vm1 = vcmask 25600   ;;  %v69_v12 = vlaneseq }
  0x1d   :  { %v52_v2 = vcombine.high %v47_v0, %v47_v0  ;;  %v57_v3 = vsel %vm56_vm0, %v47_v0, 0.0  ;;  %v53_v4 = vcombine.high %v48_v1, %v48_v1  ;;  %v62_v6 = vsel %vm56_vm0, %v48_v1, 0.0  ;;  %v90_v11 = vld [vmem:[#allocation6] sm:$0xf]  ;;  %v199_v25 = vld [vmem:[%s337_s2] ss:$0 sm:$0xff] }
  0x1e   :  { %v293_v10 = vmov 0.0   ;;  %vm294_vm2 = vmmov 0   ;;  %v70_v13 = vand.u32 127, %v69_v12  ;;  %v72_v14 = vshrl.u32 %v69_v12, 7  ;;  %s295_s24 = smov [#allocation8]  }
  0x1f   :  { %v58_v5 = vsel %vm56_vm0, %v52_v2, 0.0  ;;  %v63_v7 = vsel %vm56_vm0, %v53_v4, 0.0  ;;  %46 = vst.msk [vmem:[#allocation2] sm:$0x3] %vm45_vm1, %v293_v10  ;;  %205 = vmatprep.subr.mxu0 %v293_v10  ;;  %207 = vmatprep.mubr.msk.f32.mxu0 %vm294_vm2, %v293_v10  ;;  %vm79_vm3 = vcmask 1041409   ;;  %vm98_vm4 = vcmask 31744  }
  0x20   :  { %v59_v8 = vadd.f32 %v58_v5, %v57_v3  ;;  %v64_v9 = vadd.f32 %v63_v7, %v62_v6  ;;  %206 = vmatpush3.msk.msra.mxu0 %vm56_vm0, %v90_v11  ;;  %v73_v16 = vsub.s32 %v70_v13, %v72_v14  ;;  %s189_s25 = sshll.u32 %s295_s24, 4  ;;  %vm181_vm5 = vcmask 58368   ;;  %s190_s25 = int_to_ptr.vmem [resolvable:$true] %s189_s25 }
  0x21   :  { %s263_s26 = scalar_lea.vmem %s190_s25, 32  ;;  %p268_p11 = scmp.lt.s32.totalorder %s190_s25, %s190_s25 }
  0x22   :  { %60 = vadd.xlane.f32.xlu0 %v59_v8  ;;  %p264_p10 = scmp.ne.s32.totalorder %s190_s25, %s263_s26  ;;  %p269_p12 = scmp.lt.s32.totalorder %s263_s26, %s263_s26 }
  0x24   :  { %p270_p13 = por %p269_p12, %p268_p11 }
  0x26   :  { %65 = vadd.xlane.f32.xlu0 %v64_v9  ;;  %v49_v20 = vld [vmem:[#allocation2] sm:$0x3]  ;;  %p271_p0 = pnand %p270_p13, %p264_p10 }
  0xab   :  { %v61_v15 = vpop.xlane.xlu0 %60 }
  0xac   :  { %v74_v18 = vrot.slane %v61_v15, %v73_v16 }
  0xaf   :  { %v66_v17 = vpop.xlane.xlu0 %65 }
  0xb0   :  { %v78_v19 = vrot.slane %v66_v17, %v73_v16 }
  0xb2   :  { %v80_v21 = vsel %vm79_vm3, %v78_v19, %v74_v18 }
  0xb3   :  { %v82_v22 = vadd.f32 %v80_v21, %v49_v20 }
  0xb5   :  { %84 = vst.msk [vmem:[#allocation2] sm:$0x3] %vm45_vm1, %v82_v22 }
  0xbc   :  { %v88_v23 = vld [vmem:[#allocation2] sm:$0x3] }
  0xbd   :  { %v89_v24 = vmul.f32 0.00390625, %v88_v23 }
  0xbf   :  { %208 = vmatmul.mubr.msk.f32.vlgmr.msra.gmra.mxu0 %vm98_vm4, %v89_v24 }
 0x17f   :  { %v171_v26 = vpop.f32.mrf.mxu0 }
 0x180   :  { %v172_v27 = vadd.f32 %v199_v25, %v171_v26 }
 0x181   :  { %v209_v28 = vpop.f32.mrf.mxu0 }
 0x182   :  { %v202_v29 = vmul.f32 -1.442695, %v172_v27 }
 0x184   :  { %219 = vpow2.f32 %v202_v29 }
 0x191   :  { %v220_v30 = vpop.eup %219 }
 0x192   :  { %v178_v31 = vadd.f32 1.0, %v220_v30 }
 0x194   :  { %221 = vrcp.f32 %v178_v31 }
 0x1a1   :  { %v222_v32 = vpop.eup %221 }
 0x1a2   :  { %182 = vst.msk [vmem:[#allocation8] sm:$0x3] %vm181_vm5, %v222_v32 }
 0x1a3   :  { %274 = shalt.err (!%p271_p0)
}
 0x1a4   :  { %192 = dma.vmem_to_hbm [thread:$0]  %s190_s25, 32, %s338_s3, [#allocation5]  }
 0x1a5   :  { %287 = dma.done.wait [#allocation5], 32  }
 0x1a6   :  { %288 = vsyncadd [#allocation5], 4294967264 }
 0x1a7   :  { %196 = vsyncpa [#allocation4], 1 }
 0x1a8   :  { %197 = vsyncpa [#allocation7], 1 }
 0x1a9   :  { %198 = vsyncpa [#allocation5], 1 }

</bundles_post_ra>
